<compile_context>
chip_gen: v5e
topology: v5e:2x2
jax: 0.10.0
libtpu: 0.0.40
codegen_flags: <defaults>
</compile_context>

<pallas_src>
import functools

import jax
import jax.numpy as jnp
from jax.experimental import pallas as pl
from jax.experimental.pallas import tpu as pltpu


def _round_up(v, m):
    return ((v + m - 1) // m) * m


def _aac_policy_kernel(x_ref, w1_ref, b1_ref, w2_ref, b2_ref,
                       wh_ref, bh_ref, out_ref):
    """One batch-tile of the forward pass: trunk + fused actor/critic head.

    Matmul inputs are bf16; accumulation, bias-add and ReLU are f32.
    """
    x = x_ref[...]                                                   # bf16

    # Layer 1: (tile, obs) @ (obs, hidden_p) -> f32 accumulator.
    h1 = jnp.dot(x, w1_ref[...], preferred_element_type=jnp.float32) + b1_ref[...]
    h1 = jnp.maximum(h1, 0.0).astype(jnp.bfloat16)

    # Layer 2: (tile, hidden_p) @ (hidden_p, hidden_p) — dominant matmul.
    h2 = jnp.dot(h1, w2_ref[...], preferred_element_type=jnp.float32) + b2_ref[...]
    h2 = jnp.maximum(h2, 0.0).astype(jnp.bfloat16)

    # Fused head: columns [0:A] are action scores, column [A] is the state value.
    out_ref[...] = (
        jnp.dot(h2, wh_ref[...], preferred_element_type=jnp.float32) + bh_ref[...]
    )


@functools.partial(jax.jit, static_argnames=("batch_tile",))
def aac_policy_forward(x, params, *, batch_tile=1024):
    """Runs the AACPolicyNet forward pass via a Pallas TPU kernel.

    :param x: (N, O) float32 batch of observations.
    :param params: dict of weights (see init_params).
    :param batch_tile: max rows per grid step (rounded up to a multiple of 8).
    :return: (action_scores (N, A), state_values (N, 1)), float32.
    """
    n, obs = x.shape
    hidden = params["w1"].shape[1]
    n_actions = params["wa"].shape[1]
    head_w = n_actions + 1                      # fused actor|critic width
    hidden_p = _round_up(hidden, 128)           # lane-align the hidden dim

    # --- Parameter prep (tiny, done under jit): pad hidden to 128, fuse the
    # actor/critic heads into one (hidden_p, A+1) weight, and cast the matmul
    # operands to bf16.  Zero padding is mathematically inert; biases stay f32.
    w1 = jnp.pad(params["w1"], ((0, 0), (0, hidden_p - hidden))).astype(jnp.bfloat16)
    b1 = jnp.pad(params["b1"], ((0, 0), (0, hidden_p - hidden)))
    w2 = jnp.pad(params["w2"],
                 ((0, hidden_p - hidden), (0, hidden_p - hidden))).astype(jnp.bfloat16)
    b2 = jnp.pad(params["b2"], ((0, 0), (0, hidden_p - hidden)))
    wh = jnp.pad(jnp.concatenate([params["wa"], params["wv"]], axis=1),
                 ((0, hidden_p - hidden), (0, 0))).astype(jnp.bfloat16)
    bh = jnp.concatenate([params["ba"], params["bv"]], axis=1)

    # --- Batch tiling.  Tile is always a multiple of 8 (sublane constraint).
    batch_tile = max(8, _round_up(batch_tile, 8))
    n8 = _round_up(n, 8)
    tile = min(batch_tile, n8)
    # v7x megacore: with "parallel" grid semantics a single grid step leaves one
    # TensorCore idle.  For batches >= 512 rows that would otherwise collapse to
    # grid=(1,), split into (at least) two steps.  Harmless on v5e/v6e (1 TC).
    if n8 >= 512 and tile >= n8:
        tile = max(256, _round_up((n8 + 1) // 2, 8))
    n_pad = _round_up(n, tile)
    if n_pad != n:
        x = jnp.pad(x, ((0, n_pad - n), (0, 0)))
    x = x.astype(jnp.bfloat16)

    grid = (n_pad // tile,)

    def bcast(shape):
        # Weights / biases: same full block for every batch tile.
        return pl.BlockSpec(shape, lambda i: (0, 0))

    # Advisory cost hint for the XLA scheduler (per whole call).
    flops = 2 * n_pad * (obs * hidden_p + hidden_p * hidden_p + hidden_p * head_w)
    bytes_accessed = (
        n_pad * obs * 2                                   # x (bf16)
        + (obs * hidden_p + hidden_p * hidden_p + hidden_p * head_w) * 2  # weights
        + (2 * hidden_p + head_w) * 4                     # biases (f32)
        + n_pad * head_w * 4                              # fused output slab (f32)
    )
    cost = pl.CostEstimate(flops=flops, transcendentals=0,
                           bytes_accessed=bytes_accessed)

    out = pl.pallas_call(
        _aac_policy_kernel,
        out_shape=jax.ShapeDtypeStruct((n_pad, head_w), jnp.float32),
        grid_spec=pltpu.PrefetchScalarGridSpec(
            num_scalar_prefetch=0,
            grid=grid,
            in_specs=[
                pl.BlockSpec((tile, obs), lambda i: (i, 0)),   # x tile (bf16)
                bcast((obs, hidden_p)),                        # w1 (bf16)
                bcast((1, hidden_p)),                          # b1 (f32)
                bcast((hidden_p, hidden_p)),                   # w2 (bf16)
                bcast((1, hidden_p)),                          # b2 (f32)
                bcast((hidden_p, head_w)),                     # fused head W (bf16)
                bcast((1, head_w)),                            # fused head b (f32)
            ],
            out_specs=pl.BlockSpec((tile, head_w), lambda i: (i, 0)),
        ),
        compiler_params=pltpu.CompilerParams(
            dimension_semantics=("parallel",)
        ),
        cost_estimate=cost,
    )(x, w1, b1, w2, b2, wh, bh)

    action_scores = out[:n, :n_actions]
    state_values = out[:n, n_actions:]
    return action_scores, state_values


def init_params(key, in_features, out_actions, hidden=32):
    """Deterministic synthetic parameter init (matches nn.Linear shapes)."""
    ks = jax.random.split(key, 8)

    def lin(kw, kb, fan_in, fan_out):
        scale = 1.0 / jnp.sqrt(jnp.float32(fan_in))
        w = jax.random.uniform(kw, (fan_in, fan_out), jnp.float32, -scale, scale)
        b = jax.random.uniform(kb, (1, fan_out), jnp.float32, -scale, scale)
        return w, b

    w1, b1 = lin(ks[0], ks[1], in_features, hidden)
    w2, b2 = lin(ks[2], ks[3], hidden, hidden)
    wa, ba = lin(ks[4], ks[5], hidden, out_actions)
    wv, bv = lin(ks[6], ks[7], hidden, 1)
    return dict(w1=w1, b1=b1, w2=w2, b2=b2, wa=wa, ba=ba, wv=wv, bv=bv)


def _reference_forward_f32(x, p):
    """Pure-f32 reference (the original module semantics)."""
    h1 = jnp.maximum(x @ p["w1"] + p["b1"], 0.0)
    h2 = jnp.maximum(h1 @ p["w2"] + p["b2"], 0.0)
    return h2 @ p["wa"] + p["ba"], h2 @ p["wv"] + p["bv"]


def _reference_forward_bf16(x, p):
    """bf16-matmul / f32-accumulate reference (matches the kernel's numerics)."""
    def mm(a, w):
        return jnp.dot(a.astype(jnp.bfloat16), w.astype(jnp.bfloat16),
                       preferred_element_type=jnp.float32)
    h1 = jnp.maximum(mm(x, p["w1"]) + p["b1"], 0.0)
    h2 = jnp.maximum(mm(h1, p["w2"]) + p["b2"], 0.0)
    return mm(h2, p["wa"]) + p["ba"], mm(h2, p["wv"]) + p["bv"]


if __name__ == "__main__":
    key = jax.random.PRNGKey(0)
    k_x, k_p, k_x2, k_x3 = jax.random.split(key, 4)

    N, OBS, ACTIONS, HIDDEN = 2, 16, 4, 32
    x = jax.random.normal(k_x, (N, OBS), jnp.float32)
    params = init_params(k_p, OBS, ACTIONS, hidden=HIDDEN)

    # Small-batch check (single grid step).
    action_scores, state_values = aac_policy_forward(x, params)
    jax.block_until_ready((action_scores, state_values))
    assert action_scores.shape == (N, ACTIONS)
    assert state_values.shape == (N, 1)

    bf_act, bf_val = _reference_forward_bf16(x, params)
    f32_act, f32_val = _reference_forward_f32(x, params)
    # Tight match against the bf16-matmul reference (same numerics as kernel).
    assert jnp.allclose(action_scores, bf_act, atol=1e-3, rtol=1e-3)
    assert jnp.allclose(state_values, bf_val, atol=1e-3, rtol=1e-3)
    # Loose match against the exact-f32 module semantics (bf16 rounding only).
    assert jnp.allclose(action_scores, f32_act, atol=3e-2, rtol=3e-2)
    assert jnp.allclose(state_values, f32_val, atol=3e-2, rtol=3e-2)

    # Multi-tile check (grid + batch-padding path, explicit small tile).
    N2 = 300
    x2 = jax.random.normal(k_x2, (N2, OBS), jnp.float32)
    act2, val2 = aac_policy_forward(x2, params, batch_tile=128)
    jax.block_until_ready((act2, val2))
    bf_act2, bf_val2 = _reference_forward_bf16(x2, params)
    assert act2.shape == (N2, ACTIONS) and val2.shape == (N2, 1)
    assert jnp.allclose(act2, bf_act2, atol=1e-3, rtol=1e-3)
    assert jnp.allclose(val2, bf_val2, atol=1e-3, rtol=1e-3)

    # Megacore-split check: batch >= 512 with the default tile must produce
    # >= 2 grid steps (tile auto-halved) and still be correct.
    N3 = 1024
    x3 = jax.random.normal(k_x3, (N3, OBS), jnp.float32)
    act3, val3 = aac_policy_forward(x3, params)
    jax.block_until_ready((act3, val3))
    bf_act3, bf_val3 = _reference_forward_bf16(x3, params)
    assert act3.shape == (N3, ACTIONS) and val3.shape == (N3, 1)
    assert jnp.allclose(act3, bf_act3, atol=1e-3, rtol=1e-3)
    assert jnp.allclose(val3, bf_val3, atol=1e-3, rtol=1e-3)

    print("KERNEL_OK")
</pallas_src>

<mosaic_0001>
module attributes {stable_mosaic.version = 11 : i64} {
  func.func @_aac_policy_kernel(%arg0: i32, %arg1: memref<8x16xbf16, #tpu.memory_space<vmem>>, %arg2: memref<16x128xbf16, #tpu.memory_space<vmem>>, %arg3: memref<1x128xf32, #tpu.memory_space<vmem>>, %arg4: memref<128x128xbf16, #tpu.memory_space<vmem>>, %arg5: memref<1x128xf32, #tpu.memory_space<vmem>>, %arg6: memref<128x5xbf16, #tpu.memory_space<vmem>>, %arg7: memref<1x5xf32, #tpu.memory_space<vmem>>, %arg8: memref<8x5xf32, #tpu.memory_space<vmem>>) attributes {dimension_semantics = [#tpu.dimension_semantics<parallel>], iteration_bounds = array<i64: 1>, scalar_prefetch = 0 : i64, scratch_operands = 0 : i64, tpu.core_type = #tpu.core_type<tc>, window_params = [{transform_indices = @transform_0, window_bounds = array<i64: 8, 16>}, {pipeline_mode = #tpu.pipeline_mode<synchronous>, transform_indices = @transform_1, window_bounds = array<i64: 16, 128>}, {pipeline_mode = #tpu.pipeline_mode<synchronous>, transform_indices = @transform_2, window_bounds = array<i64: 1, 128>}, {pipeline_mode = #tpu.pipeline_mode<synchronous>, transform_indices = @transform_3, window_bounds = array<i64: 128, 128>}, {pipeline_mode = #tpu.pipeline_mode<synchronous>, transform_indices = @transform_4, window_bounds = array<i64: 1, 128>}, {pipeline_mode = #tpu.pipeline_mode<synchronous>, transform_indices = @transform_5, window_bounds = array<i64: 128, 5>}, {pipeline_mode = #tpu.pipeline_mode<synchronous>, transform_indices = @transform_6, window_bounds = array<i64: 1, 5>}, {transform_indices = @transform_7, window_bounds = array<i64: 8, 5>}]} {
    %c0 = arith.constant 0 : index
    %c0_0 = arith.constant 0 : index
    %0 = vector.load %arg1[%c0, %c0_0] : memref<8x16xbf16, #tpu.memory_space<vmem>>, vector<8x16xbf16>
    %c0_1 = arith.constant 0 : index
    %c0_2 = arith.constant 0 : index
    %1 = vector.load %arg2[%c0_1, %c0_2] : memref<16x128xbf16, #tpu.memory_space<vmem>>, vector<16x128xbf16>
    %cst = arith.constant dense<0.000000e+00> : vector<8x128xf32>
    %2 = tpu.matmul %0, %1, %cst {dimension_numbers = #tpu.dot_dimension_numbers<[1], [0], [0], [1], [0, 0, 1, 1], [], []>} : vector<8x16xbf16>, vector<16x128xbf16>, vector<8x128xf32> -> vector<8x128xf32>
    %c0_3 = arith.constant 0 : index
    %c0_4 = arith.constant 0 : index
    %3 = vector.load %arg3[%c0_3, %c0_4] : memref<1x128xf32, #tpu.memory_space<vmem>>, vector<1x128xf32>
    %4 = vector.broadcast %3 : vector<1x128xf32> to vector<8x128xf32>
    %5 = arith.addf %2, %4 : vector<8x128xf32>
    %cst_5 = arith.constant 0.000000e+00 : f32
    %6 = vector.broadcast %cst_5 : f32 to vector<8x128xf32>
    %7 = arith.maximumf %5, %6 : vector<8x128xf32>
    %8 = arith.truncf %7 : vector<8x128xf32> to vector<8x128xbf16>
    %c0_6 = arith.constant 0 : index
    %c0_7 = arith.constant 0 : index
    %9 = vector.load %arg4[%c0_6, %c0_7] : memref<128x128xbf16, #tpu.memory_space<vmem>>, vector<128x128xbf16>
    %cst_8 = arith.constant dense<0.000000e+00> : vector<8x128xf32>
    %10 = tpu.matmul %8, %9, %cst_8 {dimension_numbers = #tpu.dot_dimension_numbers<[1], [0], [0], [1], [0, 0, 1, 1], [], []>} : vector<8x128xbf16>, vector<128x128xbf16>, vector<8x128xf32> -> vector<8x128xf32>
    %c0_9 = arith.constant 0 : index
    %c0_10 = arith.constant 0 : index
    %11 = vector.load %arg5[%c0_9, %c0_10] : memref<1x128xf32, #tpu.memory_space<vmem>>, vector<1x128xf32>
    %12 = vector.broadcast %11 : vector<1x128xf32> to vector<8x128xf32>
    %13 = arith.addf %10, %12 : vector<8x128xf32>
    %cst_11 = arith.constant 0.000000e+00 : f32
    %14 = vector.broadcast %cst_11 : f32 to vector<8x128xf32>
    %15 = arith.maximumf %13, %14 : vector<8x128xf32>
    %16 = arith.truncf %15 : vector<8x128xf32> to vector<8x128xbf16>
    %c0_12 = arith.constant 0 : index
    %c0_13 = arith.constant 0 : index
    %17 = vector.load %arg6[%c0_12, %c0_13] : memref<128x5xbf16, #tpu.memory_space<vmem>>, vector<128x5xbf16>
    %cst_14 = arith.constant dense<0.000000e+00> : vector<8x5xf32>
    %18 = tpu.matmul %16, %17, %cst_14 {dimension_numbers = #tpu.dot_dimension_numbers<[1], [0], [0], [1], [0, 0, 1, 1], [], []>} : vector<8x128xbf16>, vector<128x5xbf16>, vector<8x5xf32> -> vector<8x5xf32>
    %c0_15 = arith.constant 0 : index
    %c0_16 = arith.constant 0 : index
    %19 = vector.load %arg7[%c0_15, %c0_16] : memref<1x5xf32, #tpu.memory_space<vmem>>, vector<1x5xf32>
    %20 = vector.broadcast %19 : vector<1x5xf32> to vector<8x5xf32>
    %21 = arith.addf %18, %20 : vector<8x5xf32>
    %c0_17 = arith.constant 0 : index
    %c0_18 = arith.constant 0 : index
    %22 = vector.load %arg8[%c0_17, %c0_18] : memref<8x5xf32, #tpu.memory_space<vmem>>, vector<8x5xf32>
    tpu.vector_store %arg8[%c0_17, %c0_18], %21 {strides = array<i32>} : memref<8x5xf32, #tpu.memory_space<vmem>>, vector<8x5xf32>,
    return
  }
  func.func @transform_0(%arg0: i32) -> (i32, i32) {
    %c0_i32 = arith.constant 0 : i32
    %c0_i32_0 = arith.constant 0 : i32
    return %arg0, %c0_i32 : i32, i32
  }
  func.func @transform_1(%arg0: i32) -> (i32, i32) {
    %c0_i32 = arith.constant 0 : i32
    %c0_i32_0 = arith.constant 0 : i32
    %c0_i32_1 = arith.constant 0 : i32
    return %c0_i32, %c0_i32_0 : i32, i32
  }
  func.func @transform_2(%arg0: i32) -> (i32, i32) {
    %c0_i32 = arith.constant 0 : i32
    %c0_i32_0 = arith.constant 0 : i32
    %c0_i32_1 = arith.constant 0 : i32
    return %c0_i32, %c0_i32_0 : i32, i32
  }
  func.func @transform_3(%arg0: i32) -> (i32, i32) {
    %c0_i32 = arith.constant 0 : i32
    %c0_i32_0 = arith.constant 0 : i32
    %c0_i32_1 = arith.constant 0 : i32
    return %c0_i32, %c0_i32_0 : i32, i32
  }
  func.func @transform_4(%arg0: i32) -> (i32, i32) {
    %c0_i32 = arith.constant 0 : i32
    %c0_i32_0 = arith.constant 0 : i32
    %c0_i32_1 = arith.constant 0 : i32
    return %c0_i32, %c0_i32_0 : i32, i32
  }
  func.func @transform_5(%arg0: i32) -> (i32, i32) {
    %c0_i32 = arith.constant 0 : i32
    %c0_i32_0 = arith.constant 0 : i32
    %c0_i32_1 = arith.constant 0 : i32
    return %c0_i32, %c0_i32_0 : i32, i32
  }
  func.func @transform_6(%arg0: i32) -> (i32, i32) {
    %c0_i32 = arith.constant 0 : i32
    %c0_i32_0 = arith.constant 0 : i32
    %c0_i32_1 = arith.constant 0 : i32
    return %c0_i32, %c0_i32_0 : i32, i32
  }
  func.func @transform_7(%arg0: i32) -> (i32, i32) {
    %c0_i32 = arith.constant 0 : i32
    %c0_i32_0 = arith.constant 0 : i32
    return %arg0, %c0_i32 : i32, i32
  }
}

</mosaic_0001>

<bundles_post_ra>
// kernel: aac_policy_forward.1
= control target key start
LH: loop header
LB: loop body
LE: loop exit
PB: predicated region body
PF: predicated region fallthrough
CT: control target
= control target key end

     0   :  { %vm40_vm0 = vcmask 130048   ;;  %vm223_vm1 = vcmask 39936   ;;  %s424_s1 = inlined_call_operand.vmem [shape: bf16[16,128], index: 1, kind: input, shape index: {}]   ;;  %s425_s0 = inlined_call_operand.vmem [shape: bf16[8,16], index: 0, kind: input, shape index: {}]   ;;  %s426_s3 = inlined_call_operand.vmem [shape: bf16[128,128], index: 3, kind: input, shape index: {}]   ;;  %s427_s2 = inlined_call_operand.vmem [shape: f32[1,128], index: 2, kind: input, shape index: {}]   ;;  %s428_s4 = inlined_call_operand.vmem [shape: f32[1,128], index: 4, kind: input, shape index: {}]   ;;  %s429_s5 = inlined_call_operand.vmem [shape: bf16[128,5], index: 5, kind: input, shape index: {}]   ;;  %s430_s6 = inlined_call_operand.vmem [shape: f32[1,5], index: 6, kind: input, shape index: {}]   ;;  %s431_s7 = inlined_call_operand.vmem [shape: f32[8,5], index: 7, kind: output, shape index: {}]  }
   0x1   :  { %v298_v0 = vld [vmem:[%s424_s1] sm:$0xff]  ;;  %v306_v1 = vld [vmem:[%s426_s3 + $0x38] sm:$0xff]  ;;  %v305_v3 = vld [vmem:[%s426_s3 + $0x30] sm:$0xff] }
   0x2   :  { %51 = vmatpush.bf16.msra.mxu0 %v298_v0  ;;  %v27_v2 = vld [vmem:[%s425_s0] sm:$0xf]  ;;  %127 = vmatpush.bf16.msra.mxu1 %v306_v1  ;;  %v304_v4 = vld [vmem:[%s426_s3 + $0x28] sm:$0xff]  ;;  %v302_v6 = vld [vmem:[%s426_s3 + $0x18] sm:$0xff] }
   0x3   :  { %v303_v5 = vld [vmem:[%s426_s3 + $0x20] sm:$0xff]  ;;  %v301_v7 = vld [vmem:[%s426_s3 + $0x10] sm:$0xff]  ;;  %v300_v8 = vld [vmem:[%s426_s3 + $0x8] sm:$0xff] }
   0x4   :  { %v299_v9 = vld [vmem:[%s426_s3] sm:$0xff]  ;;  %v314_v10 = vld [vmem:[%s429_s5 + $0x38] sm:$0xff]  ;;  %v313_v11 = vld [vmem:[%s429_s5 + $0x30] sm:$0xff] }
   0x5   :  { %233 = vmatmul.msk.bf16.vlgmr.msra.gmra.mxu0 %vm40_vm0, %v27_v2  ;;  %210 = vmatpush.bf16.msra.mxu2 %v314_v10  ;;  %v312_v12 = vld [vmem:[%s429_s5 + $0x28] sm:$0xff]  ;;  %v311_v13 = vld [vmem:[%s429_s5 + $0x20] sm:$0xff]  ;;  %v310_v14 = vld [vmem:[%s429_s5 + $0x18] sm:$0xff] }
   0x6   :  { %128 = vmatpush.bf16.msra.mxu1 %v305_v3  ;;  %v309_v15 = vld [vmem:[%s429_s5 + $0x10] sm:$0xff]  ;;  %v315_v16 = vld [vmem:[%s427_s2] ss:$0 sm:$0xff]  ;;  %v308_v22 = vld [vmem:[%s429_s5 + $0x8] sm:$0xff] }
   0x7   :  { %v307_v23 = vld [vmem:[%s429_s5] sm:$0xff] }
   0x8   :  { %v316_v24 = vld [vmem:[%s428_s4] ss:$0 sm:$0xff] }
   0x9   :  { %211 = vmatpush.bf16.msra.mxu2 %v313_v11  ;;  %v317_v30 = vld [vmem:[%s430_s6] ss:$0 sm:$0xff] }
   0xa   :  { %129 = vmatpush.bf16.msra.mxu1 %v304_v4 }
   0xd   :  { %212 = vmatpush.bf16.msra.mxu2 %v312_v12 }
   0xe   :  { %130 = vmatpush.bf16.msra.mxu1 %v303_v5 }
  0x11   :  { %213 = vmatpush.bf16.msra.mxu2 %v311_v13 }
  0x12   :  { %131 = vmatpush.bf16.msra.mxu1 %v302_v6 }
  0x15   :  { %214 = vmatpush.bf16.msra.mxu2 %v310_v14 }
  0x16   :  { %132 = vmatpush.bf16.msra.mxu1 %v301_v7 }
  0x19   :  { %215 = vmatpush.bf16.msra.mxu2 %v309_v15 }
  0x1a   :  { %133 = vmatpush.bf16.msra.mxu1 %v300_v8 }
  0x1d   :  { %216 = vmatpush.bf16.msra.mxu2 %v308_v22 }
  0x1e   :  { %134 = vmatpush.bf16.msra.mxu1 %v299_v9 }
  0x21   :  { %217 = vmatpush.bf16.msra.mxu2 %v307_v23 }
  0x82   :  { %v53_v17 = vpop.f32.mrf.mxu0 }
  0x83   :  { %v54_v18 = vadd.f32 %v315_v16, %v53_v17 }
  0x85   :  { %v57_v19 = vmax.f32 %v54_v18, 0.0 }
  0x87   :  { %v58_v20 = vpack.c.bf16 %v57_v19, %v57_v19 }
  0x89   :  { %135 = vmatmul.bf16.vlgmr.msra.gmra.mxu1 %v58_v20 }
  0x8a   :  { %v55_v21 = vpop.f32.mrf.mxu0 }
 0x106   :  { %v136_v25 = vpop.f32.mrf.mxu1 }
 0x107   :  { %v137_v26 = vadd.f32 %v316_v24, %v136_v25 }
 0x109   :  { %v140_v27 = vmax.f32 %v137_v26, 0.0 }
 0x10b   :  { %v141_v28 = vpack.c.bf16 %v140_v27, %v140_v27 }
 0x10d   :  { %218 = vmatmul.bf16.vlgmr.msra.gmra.mxu2 %v141_v28 }
 0x10e   :  { %v138_v29 = vpop.f32.mrf.mxu1 }
 0x190   :  { %v219_v31 = vpop.f32.mrf.mxu2 }
 0x191   :  { %v220_v32 = vadd.f32 %v317_v30, %v219_v31 }
 0x193   :  { %224 = vst.msk [vmem:[%s431_s7] sm:$0xff] %vm223_vm1, %v220_v32 }
 0x198   :  { %v221_v33 = vpop.f32.mrf.mxu2 }

</bundles_post_ra>
